<compile_context>
chip_gen: v7x
topology: tpu7x:2x2x1
jax: 0.10.0
libtpu: 0.0.40
codegen_flags: <defaults>
</compile_context>

<pallas_src>
import jax
import jax.numpy as jnp
from jax.experimental import pallas as pl
from jax.experimental.pallas import tpu as pltpu


def _round_up(n, m):
    return ((n + m - 1) // m) * m


def _slab_layout(n_states, hidden):
    """Row offsets of each parameter inside the packed slab (all 8-aligned)."""
    row_w1 = 0
    row_b1 = _round_up(n_states, 8)
    row_w2 = row_b1 + 8
    row_b2 = row_w2 + hidden
    row_w3 = row_b2 + 8
    total = row_w3 + 8
    return row_w1, row_b1, row_w2, row_b2, row_w3, total


def pack_critic_params(params):
    """Pack w1/b1/w2/b2/w3 into one (rows, hidden) f32 slab; b3 kept as (1,1) scalar."""
    n_states, hidden = params["w1"].shape
    _, row_b1, row_w2, row_b2, row_w3, total = _slab_layout(n_states, hidden)
    slab = jnp.zeros((total, hidden), jnp.float32)
    slab = slab.at[0:n_states, :].set(params["w1"].astype(jnp.float32))
    slab = slab.at[row_b1, :].set(params["b1"].reshape(hidden).astype(jnp.float32))
    slab = slab.at[row_w2:row_w2 + hidden, :].set(params["w2"].astype(jnp.float32))
    slab = slab.at[row_b2, :].set(params["b2"].reshape(hidden).astype(jnp.float32))
    slab = slab.at[row_w3, :].set(params["w3"].reshape(hidden).astype(jnp.float32))
    b3 = params["b3"].reshape(1, 1).astype(jnp.float32)
    return slab, b3


def _make_critic_kernel(n_states, hidden):
    _, row_b1, row_w2, row_b2, row_w3, _ = _slab_layout(n_states, hidden)

    def kernel(x_ref, slab_ref, b3_ref, o_ref):
        x = x_ref[...]                                              # (B, n_states) f32
        # Layer 1: n_states VPU broadcast-FMAs (MXU would be ~97% empty at K=4
        # and its push/pop latency would sit on the latency-bound critical path).
        acc = slab_ref[row_b1:row_b1 + 1, :]                        # b1, (1, hidden)
        for k in range(n_states):                                   # static unroll
            acc = acc + x[:, k:k + 1] * slab_ref[k:k + 1, :]
        h1 = jnp.tanh(acc)                                          # (B, hidden), EUP
        # Layer 2: the only nontrivial MXU work.
        w2 = slab_ref[row_w2:row_w2 + hidden, :]                    # (hidden, hidden)
        b2 = slab_ref[row_b2:row_b2 + 1, :]                         # (1, hidden)
        h2 = jnp.tanh(jnp.dot(h1, w2, preferred_element_type=jnp.float32) + b2)
        # Value head, lane-dense: (1,hidden) . (B,hidden)^T -> (1, B) so the
        # batch lands on the lane axis and the store is an unmasked full-lane vst.
        w3 = slab_ref[row_w3:row_w3 + 1, :]                         # (1, hidden)
        v = jax.lax.dot_general(w3, h2, (((1,), (1,)), ((), ())),
                                preferred_element_type=jnp.float32)  # (1, B)
        o_ref[...] = (v + b3_ref[0, 0]).astype(o_ref.dtype)

    return kernel


def _tensorcores_per_chip():
    """Best-effort TC count; only changes the dispatch threshold, never correctness."""
    try:
        kind = jax.devices()[0].device_kind.lower()
    except Exception:
        return 1
    return 2 if "v7" in kind else 1       # v5e/v6e: 1 TC; v7x: 2 TCs


def critic_net_forward(x, slab, b3, *, batch_tile=1024, single_block_max=None,
                       force_grid=False):
    """CriticNet forward via Pallas.

    x:    (batch, n_states) float32
    slab: packed parameter slab from pack_critic_params
    b3:   (1, 1) float32
    returns (batch, 1) float32
    """
    batch, n_states = x.shape
    hidden = slab.shape[1]
    *_, total_rows = _slab_layout(n_states, hidden)
    assert slab.shape[0] == total_rows, (slab.shape, total_rows)

    kernel = _make_critic_kernel(n_states, hidden)

    if single_block_max is None:
        # v7x (2 TCs): go to the parallel grid once it has >= 2 full tiles.
        # Single-TC chips (v5e/v6e): the grid is a serial loop + per-step
        # overhead, so stay on one ungridded call until VMEM actually pushes back.
        single_block_max = 2 * batch_tile if _tensorcores_per_chip() >= 2 else 4096

    if not force_grid and batch <= single_block_max:
        # Latency-bound regime: one launch, full-array VMEM blocks, b3 in SMEM.
        out = pl.pallas_call(
            kernel,
            out_shape=jax.ShapeDtypeStruct((1, batch), jnp.float32),
            in_specs=[
                pl.BlockSpec(memory_space=pltpu.MemorySpace.VMEM),   # x
                pl.BlockSpec(memory_space=pltpu.MemorySpace.VMEM),   # param slab
                pl.BlockSpec(memory_space=pltpu.MemorySpace.SMEM),   # b3 scalar
            ],
            out_specs=pl.BlockSpec(memory_space=pltpu.MemorySpace.VMEM),
        )(x, slab, b3)
        return out.reshape(batch, 1)

    # Large-batch path: 1-D "parallel" grid over batch (uses v7x's 2nd TC),
    # slab resident in VMEM (constant index_map => fetched once), lane-dense
    # (1, batch) output so writebacks are unmasked full-lane stores.
    tb = batch_tile
    out = pl.pallas_call(
        kernel,
        out_shape=jax.ShapeDtypeStruct((1, batch), jnp.float32),
        grid=(pl.cdiv(batch, tb),),
        in_specs=[
            pl.BlockSpec((tb, n_states), lambda i: (i, 0)),          # activation stream
            pl.BlockSpec((total_rows, hidden), lambda i: (0, 0)),    # slab (resident)
            pl.BlockSpec((1, 1), lambda i: (0, 0),
                         memory_space=pltpu.MemorySpace.SMEM),       # b3 scalar
        ],
        out_specs=pl.BlockSpec((1, tb), lambda i: (0, i)),
        compiler_params=pltpu.CompilerParams(
            dimension_semantics=("parallel",)),
    )(x, slab, b3)
    return out.reshape(batch, 1)


def init_critic_params(key, n_states, hidden=128):
    """PyTorch nn.Linear-style init (U[-1/sqrt(fan_in), +1/sqrt(fan_in)]).

    w1/w2 stored pre-transposed as (in, out); w3 as (1, hidden); b3 as (1, 1).
    """
    k1, k2, k3, k4, k5, k6 = jax.random.split(key, 6)

    def uniform(k, shape, fan_in):
        bound = 1.0 / jnp.sqrt(jnp.float32(fan_in))
        return jax.random.uniform(k, shape, jnp.float32, -bound, bound)

    return {
        "w1": uniform(k1, (n_states, hidden), n_states),
        "b1": uniform(k2, (1, hidden), n_states),
        "w2": uniform(k3, (hidden, hidden), hidden),
        "b2": uniform(k4, (1, hidden), hidden),
        "w3": uniform(k5, (1, hidden), hidden),
        "b3": uniform(k6, (1, 1), hidden),
    }


def reference_forward(x, params):
    """Pure-JAX reference for correctness check."""
    h1 = jnp.tanh(x @ params["w1"] + params["b1"])
    h2 = jnp.tanh(h1 @ params["w2"] + params["b2"])
    return h2 @ params["w3"].T + params["b3"]


if __name__ == "__main__":
    key = jax.random.PRNGKey(0)
    k_params, k_small, k_mid, k_rag = jax.random.split(key, 4)

    n_states = 4   # CartPole observation dim
    params = init_critic_params(k_params, n_states)
    slab, b3 = pack_critic_params(params)

    # 1) Small A2C batch: single fused, latency-optimized launch (2 DMAs + 1 SMEM).
    x_small = jax.random.normal(k_small, (8, n_states), dtype=jnp.float32)
    out_small = jax.block_until_ready(critic_net_forward(x_small, slab, b3))
    ref_small = reference_forward(x_small, params)
    assert out_small.shape == (8, 1), out_small.shape
    assert jnp.allclose(out_small, ref_small, atol=1e-4, rtol=1e-4)

    # 2) Moderate batch: generation-aware dispatch (single block on 1-TC chips,
    #    parallel grid only where a second TensorCore exists).
    x_mid = jax.random.normal(k_mid, (2048, n_states), dtype=jnp.float32)
    out_mid = jax.block_until_ready(critic_net_forward(x_mid, slab, b3))
    ref_mid = reference_forward(x_mid, params)
    assert out_mid.shape == (2048, 1), out_mid.shape
    assert jnp.allclose(out_mid, ref_mid, atol=1e-4, rtol=1e-4)

    # 3) Ragged batch on the forced grid path: exercises partial-tile read/write
    #    clipping (garbage rows never reach valid output lanes).
    x_rag = jax.random.normal(k_rag, (2048 + 7, n_states), dtype=jnp.float32)
    out_rag = jax.block_until_ready(
        critic_net_forward(x_rag, slab, b3, force_grid=True))
    ref_rag = reference_forward(x_rag, params)
    assert out_rag.shape == (2048 + 7, 1), out_rag.shape
    assert jnp.allclose(out_rag, ref_rag, atol=1e-4, rtol=1e-4)

    print("KERNEL_OK")
</pallas_src>

<mosaic_0001>
module attributes {stable_mosaic.version = 11 : i64} {
  func.func @kernel(%arg0: memref<8x4xf32, #tpu.memory_space<vmem>>, %arg1: memref<160x128xf32, #tpu.memory_space<vmem>>, %arg2: memref<1x1xf32, #tpu.memory_space<smem>>, %arg3: memref<1x8xf32, #tpu.memory_space<vmem>>) attributes {dimension_semantics = [], scalar_prefetch = 0 : i64, scratch_operands = 0 : i64, tpu.core_type = #tpu.core_type<tc>} {
    %c0 = arith.constant 0 : index
    %c0_0 = arith.constant 0 : index
    %0 = vector.load %arg0[%c0, %c0_0] : memref<8x4xf32, #tpu.memory_space<vmem>>, vector<8x4xf32>
    %c8 = arith.constant 8 : index
    %c0_1 = arith.constant 0 : index
    %1 = vector.load %arg1[%c8, %c0_1] : memref<160x128xf32, #tpu.memory_space<vmem>>, vector<1x128xf32>
    %2 = vector.extract_strided_slice %0 {offsets = [0, 0], sizes = [8, 1], strides = [1, 1]} : vector<8x4xf32> to vector<8x1xf32>
    %c0_2 = arith.constant 0 : index
    %c0_3 = arith.constant 0 : index
    %3 = vector.load %arg1[%c0_2, %c0_3] : memref<160x128xf32, #tpu.memory_space<vmem>>, vector<1x128xf32>
    %4 = vector.broadcast %2 : vector<8x1xf32> to vector<8x128xf32>
    %5 = vector.broadcast %3 : vector<1x128xf32> to vector<8x128xf32>
    %6 = arith.mulf %4, %5 : vector<8x128xf32>
    %7 = vector.broadcast %1 : vector<1x128xf32> to vector<8x128xf32>
    %8 = arith.addf %7, %6 : vector<8x128xf32>
    %9 = vector.extract_strided_slice %0 {offsets = [0, 1], sizes = [8, 1], strides = [1, 1]} : vector<8x4xf32> to vector<8x1xf32>
    %c1 = arith.constant 1 : index
    %c0_4 = arith.constant 0 : index
    %10 = vector.load %arg1[%c1, %c0_4] : memref<160x128xf32, #tpu.memory_space<vmem>>, vector<1x128xf32>
    %11 = vector.broadcast %9 : vector<8x1xf32> to vector<8x128xf32>
    %12 = vector.broadcast %10 : vector<1x128xf32> to vector<8x128xf32>
    %13 = arith.mulf %11, %12 : vector<8x128xf32>
    %14 = arith.addf %8, %13 : vector<8x128xf32>
    %15 = vector.extract_strided_slice %0 {offsets = [0, 2], sizes = [8, 1], strides = [1, 1]} : vector<8x4xf32> to vector<8x1xf32>
    %c2 = arith.constant 2 : index
    %c0_5 = arith.constant 0 : index
    %16 = vector.load %arg1[%c2, %c0_5] : memref<160x128xf32, #tpu.memory_space<vmem>>, vector<1x128xf32>
    %17 = vector.broadcast %15 : vector<8x1xf32> to vector<8x128xf32>
    %18 = vector.broadcast %16 : vector<1x128xf32> to vector<8x128xf32>
    %19 = arith.mulf %17, %18 : vector<8x128xf32>
    %20 = arith.addf %14, %19 : vector<8x128xf32>
    %21 = vector.extract_strided_slice %0 {offsets = [0, 3], sizes = [8, 1], strides = [1, 1]} : vector<8x4xf32> to vector<8x1xf32>
    %c3 = arith.constant 3 : index
    %c0_6 = arith.constant 0 : index
    %22 = vector.load %arg1[%c3, %c0_6] : memref<160x128xf32, #tpu.memory_space<vmem>>, vector<1x128xf32>
    %23 = vector.broadcast %21 : vector<8x1xf32> to vector<8x128xf32>
    %24 = vector.broadcast %22 : vector<1x128xf32> to vector<8x128xf32>
    %25 = arith.mulf %23, %24 : vector<8x128xf32>
    %26 = arith.addf %20, %25 : vector<8x128xf32>
    %27 = math.tanh %26 : vector<8x128xf32>
    %c16 = arith.constant 16 : index
    %c0_7 = arith.constant 0 : index
    %28 = vector.load %arg1[%c16, %c0_7] : memref<160x128xf32, #tpu.memory_space<vmem>>, vector<128x128xf32>
    %c144 = arith.constant 144 : index
    %c0_8 = arith.constant 0 : index
    %29 = vector.load %arg1[%c144, %c0_8] : memref<160x128xf32, #tpu.memory_space<vmem>>, vector<1x128xf32>
    %cst = arith.constant dense<0.000000e+00> : vector<8x128xf32>
    %30 = tpu.matmul %27, %28, %cst {dimension_numbers = #tpu.dot_dimension_numbers<[1], [0], [0], [1], [0, 0, 1, 1], [], []>} : vector<8x128xf32>, vector<128x128xf32>, vector<8x128xf32> -> vector<8x128xf32>
    %31 = vector.broadcast %29 : vector<1x128xf32> to vector<8x128xf32>
    %32 = arith.addf %30, %31 : vector<8x128xf32>
    %33 = math.tanh %32 : vector<8x128xf32>
    %c152 = arith.constant 152 : index
    %c0_9 = arith.constant 0 : index
    %34 = vector.load %arg1[%c152, %c0_9] : memref<160x128xf32, #tpu.memory_space<vmem>>, vector<1x128xf32>
    %cst_10 = arith.constant dense<0.000000e+00> : vector<1x8xf32>
    %35 = tpu.matmul %34, %33, %cst_10 {dimension_numbers = #tpu.dot_dimension_numbers<[1], [1], [0], [0], [0, 0, 1, 0], [], []>} : vector<1x128xf32>, vector<8x128xf32>, vector<1x8xf32> -> vector<1x8xf32>
    %c0_11 = arith.constant 0 : index
    %c0_12 = arith.constant 0 : index
    %36 = memref.load %arg2[%c0_11, %c0_12] : memref<1x1xf32, #tpu.memory_space<smem>>
    %37 = vector.broadcast %36 : f32 to vector<1x8xf32>
    %38 = arith.addf %35, %37 : vector<1x8xf32>
    %c0_13 = arith.constant 0 : index
    %c0_14 = arith.constant 0 : index
    %39 = vector.load %arg3[%c0_13, %c0_14] : memref<1x8xf32, #tpu.memory_space<vmem>>, vector<1x8xf32>
    tpu.vector_store %arg3[%c0_13, %c0_14], %38 {strides = array<i32>} : memref<1x8xf32, #tpu.memory_space<vmem>>, vector<1x8xf32>,
    return
  }
}

</mosaic_0001>

<bundles_post_ra>
// kernel: tpu_custom_call.1
= control target key start
LH: loop header
LB: loop body
LE: loop exit
PB: predicated region body
PF: predicated region fallthrough
CT: control target
= control target key end

     0   :  { %9 = vsyncpa [#allocation4], 0  ;;  %s482_s0 = inlined_call_operand.vmem [shape: f32[8,4], index: 0, kind: input, shape index: {}]   ;;  %s483_s1 = inlined_call_operand.hbm [shape: f32[160,128], index: 1, kind: input, shape index: {}]   ;;  %s484_s2 = inlined_call_operand.<no memory space> [shape: f32[1,1], index: 2, kind: input, shape index: {}]   ;;  %s485_s3 = inlined_call_operand.hbm [shape: f32[1,8], index: 3, kind: output, shape index: {}]  }
   0x1   :  { %10 = vsyncpa [#allocation5], 0  ;;  %s421_s12 = smov [#allocation3]   ;;  %s373_s16 = scalar_lea.hbm %s483_s1, 2560 }
   0x2   :  { %s18_s13 = sshll.u32 %s421_s12, 4  ;;  %p374_p0 = scmp.ne.s32.totalorder %s483_s1, %s373_s16  ;;  %s19_s13 = int_to_ptr.vmem [resolvable:$true] %s18_s13 }
   0x3   :  { %p377_p1 = scmp.lt.u32.totalorder %s373_s16, %s483_s1 }
   0x5   :  { %p379_p2 = pnand %p377_p1, %p374_p0 }
   0x7   :  { %382 = shalt.err (!%p379_p2)
}
   0x8   :  { %s383_s21 = scalar_lea.vmem %s19_s13, 2560  ;;  %p388_p4 = scmp.lt.s32.totalorder %s19_s13, %s19_s13 }
   0x9   :  { %p384_p3 = scmp.ne.s32.totalorder %s19_s13, %s383_s21  ;;  %p389_p5 = scmp.lt.s32.totalorder %s383_s21, %s383_s21 }
   0xb   :  { %p390_p6 = por %p389_p5, %p388_p4 }
   0xd   :  { %p391_p7 = pnand %p390_p6, %p384_p3 }
   0xf   :  { %394 = shalt.err (!%p391_p7)
}
  0x10   :  { %s422_s22 = smov 128   ;;  %s423_s23 = smov 8  }
  0x11   :  { %24 = dma.hbm_to_vmem [thread:$0]  %s483_s1, 2560, %s19_s13, [#allocation4], %s422_s22, %s422_s22, %s423_s23  }
  0x12   :  { %417 = dma.done.wait [#allocation4], 2560  }
  0x13   :  { %418 = vsyncadd [#allocation4], 4294964736  ;;  %v424_v0 = vmov 0   ;;  %v425_v1 = vmov 2   ;;  %v426_v2 = vmov 0.0|0.0   ;;  %v30_v3 = vld [vmem:[%s482_s0] sm:$0xff]  ;;  %v176_v55 = vstv %s484_s2 }
  0x14   :  { %364 = vset.pattern.permute.xlu0 %v424_v0  ;;  %366 = vset.pattern.permute.xlu1 %v425_v1  ;;  %v82_v4 = vld [vmem:[#allocation3 + $0x10] sm:$0xff]  ;;  %v83_v5 = vld [vmem:[#allocation3 + $0x18] sm:$0xff]  ;;  %v84_v7 = vld [vmem:[#allocation3 + $0x20] sm:$0xff]  ;;  %v427_v12 = vmov 1   ;;  %v428_v13 = vmov 3   ;;  %vm429_vm0 = vmmov 0  }
  0x15   :  { %329 = vmatprep.subr.bf16.mxu0 %v426_v2  ;;  %35 = vperm.xlu0 %364, %v30_v3   ;;  %v330_v6 = vpack.c.bf16 %v83_v5, %v82_v4  ;;  %v85_v8 = vld [vmem:[#allocation3 + $0x28] sm:$0xff]  ;;  %v86_v10 = vld [vmem:[#allocation3 + $0x30] sm:$0xff]  ;;  %v87_v11 = vld [vmem:[#allocation3 + $0x38] sm:$0xff]  ;;  %v430_v21 = vmov 0.0   ;;  %s431_s28 = smov [#allocation6]   ;;  %vm247_vm1 = vcmask 57344  }
  0x16   :  { %61 = vperm.xlu1 %366, %v30_v3   ;;  %v333_v9 = vpack.c.bf16 %v85_v8, %v84_v7  ;;  %v336_v14 = vpack.c.bf16 %v87_v11, %v86_v10  ;;  %v88_v15 = vld [vmem:[#allocation3 + $0x40] sm:$0xff]  ;;  %v89_v16 = vld [vmem:[#allocation3 + $0x48] sm:$0xff]  ;;  %v90_v18 = vld [vmem:[#allocation3 + $0x50] sm:$0xff]  ;;  %321 = vmatprep.mubr.msk.f32.mxu0 %vm429_vm0, %v430_v21  ;;  %s255_s29 = sshll.u32 %s431_s28, 4  ;;  %s256_s29 = int_to_ptr.vmem [resolvable:$true] %s255_s29 }
  0x17   :  { %331 = vmatpush3.bf16.msra.mxu0 %v330_v6  ;;  %v339_v17 = vpack.c.bf16 %v89_v16, %v88_v15  ;;  %v91_v19 = vld [vmem:[#allocation3 + $0x58] sm:$0xff]  ;;  %v92_v22 = vld [vmem:[#allocation3 + $0x60] sm:$0xff]  ;;  %v93_v23 = vld [vmem:[#allocation3 + $0x68] sm:$0xff]  ;;  %324 = vmatprep.subr.mxu1 %v430_v21  ;;  %s395_s30 = scalar_lea.vmem %s256_s29, 16  ;;  %s399_s4 = scalar_lea.vmem %s256_s29, 32 }
  0x18   :  { %332 = vmatprep.subr.bf16.mxu0 %v426_v2  ;;  %v342_v20 = vpack.c.bf16 %v91_v19, %v90_v18  ;;  %326 = vmatprep.mubr.msk.f32.mxu1 %vm429_vm0, %v430_v21  ;;  %v345_v24 = vpack.c.bf16 %v93_v23, %v92_v22  ;;  %v94_v25 = vld [vmem:[#allocation3 + $0x70] sm:$0xff]  ;;  %v95_v26 = vld [vmem:[#allocation3 + $0x78] sm:$0xff]  ;;  %v96_v28 = vld [vmem:[#allocation3 + $0x80] sm:$0xff]  ;;  %p396_p8 = scmp.ne.s32.totalorder %s256_s29, %s395_s30  ;;  %p400_p9 = scmp.lt.s32.totalorder %s256_s29, %s256_s29 }
  0x19   :  { %365 = vset.pattern.permute.xlu0 %v427_v12  ;;  %v348_v27 = vpack.c.bf16 %v95_v26, %v94_v25  ;;  %v97_v29 = vld [vmem:[#allocation3 + $0x88] sm:$0xff]  ;;  %v264_v31 = vld [vmem:[#allocation3] ss:$0 sm:$0xff]  ;;  %v266_v36 = vld [vmem:[#allocation3 + $0x1] ss:$0 sm:$0xff]  ;;  %p401_p10 = scmp.lt.s32.totalorder %s399_s4, %s395_s30 }
  0x1a   :  { %367 = vset.pattern.permute.xlu1 %v428_v13  ;;  %50 = vperm.xlu0 %365, %v30_v3   ;;  %v351_v30 = vpack.c.bf16 %v97_v29, %v96_v28  ;;  %v265_v35 = vld [vmem:[#allocation3 + $0x8] ss:$0 sm:$0xff]  ;;  %v267_v37 = vld [vmem:[#allocation3 + $0x2] ss:$0 sm:$0xff]  ;;  %v268_v39 = vld [vmem:[#allocation3 + $0x3] ss:$0 sm:$0xff] }
  0x1b   :  { %72 = vperm.xlu1 %367, %v30_v3   ;;  %334 = vmatpush3.bf16.msra.mxu0 %v333_v9  ;;  %v269_v49 = vld [vmem:[#allocation3 + $0x90] ss:$0 sm:$0xff]  ;;  %v174_v54 = vld [vmem:[#allocation3 + $0x98] sm:$0x1]  ;;  %p402_p11 = por %p401_p10, %p400_p9 }
  0x1c   :  { %335 = vmatprep.subr.bf16.mxu0 %v426_v2 }
  0x1d   :  { %p403_p12 = pnand %p402_p11, %p396_p8 }
  0x1e   :  { %368 = vset.pattern.permute.xlu0 %v428_v13 }
  0x1f   :  { %337 = vmatpush3.bf16.msra.mxu0 %v336_v14 }
  0x20   :  { %338 = vmatprep.subr.bf16.mxu0 %v426_v2 }
  0x23   :  { %340 = vmatpush3.bf16.msra.mxu0 %v339_v17 }
  0x24   :  { %341 = vmatprep.subr.bf16.mxu0 %v426_v2 }
  0x27   :  { %343 = vmatpush3.bf16.msra.mxu0 %v342_v20 }
  0x28   :  { %344 = vmatprep.subr.bf16.mxu0 %v426_v2 }
  0x2b   :  { %346 = vmatpush3.bf16.msra.mxu0 %v345_v24 }
  0x2c   :  { %347 = vmatprep.subr.bf16.mxu0 %v426_v2 }
  0x2f   :  { %349 = vmatpush3.bf16.msra.mxu0 %v348_v27 }
  0x30   :  { %350 = vmatprep.subr.bf16.mxu0 %v426_v2 }
  0x33   :  { %352 = vmatpush3.bf16.msra.mxu0 %v351_v30 }
  0x94   :  { %v36_v32 = vpop.permute.xlu0 %35 }
  0x95   :  { %v62_v33 = vpop.permute.xlu1 %61  ;;  %v42_v34 = vmul.f32 %v264_v31, %v36_v32 }
  0x96   :  { %v68_v43 = vmul.f32 %v267_v37, %v62_v33 }
  0x97   :  { %v47_v41 = vadd.f32 %v265_v35, %v42_v34 }
  0x99   :  { %v51_v38 = vpop.permute.xlu0 %50 }
  0x9a   :  { %v73_v40 = vpop.permute.xlu1 %72  ;;  %v57_v42 = vmul.f32 %v266_v36, %v51_v38 }
  0x9b   :  { %v79_v45 = vmul.f32 %v268_v39, %v73_v40 }
  0x9c   :  { %v58_v44 = vadd.f32 %v57_v42, %v47_v41 }
  0x9e   :  { %v69_v46 = vadd.f32 %v68_v43, %v58_v44 }
  0xa0   :  { %v80_v47 = vadd.f32 %v79_v45, %v69_v46 }
  0xa2   :  { %369 = vtanh.f32 %v80_v47 }
  0xac   :  { %v370_v48 = vpop.eup %369 }
  0xad   :  { %322 = vmatmul.mubr.f32.vlgmr.msra.gmra.mrb[0].mxu0 %v370_v48 }
 0x180   :  { %v169_v50 = vpop.f32.mrb[0].mxu0 }
 0x181   :  { %v170_v51 = vadd.f32 %v269_v49, %v169_v50  ;;  %v323_v52 = vpop.f32.mrb[1].mxu0 }
 0x183   :  { %371 = vtanh.f32 %v170_v51 }
 0x18d   :  { %v372_v53 = vpop.eup %371 }
 0x18e   :  { %325 = vmatpush3.xpose.msra.mxu1 %v372_v53 }
 0x191   :  { %327 = vmatmul.mubr.f32.vlgmr.msra.gmra.mrb[0].mxu1 %v174_v54 }
 0x264   :  { %v243_v56 = vpop.f32.mrb[0].mxu1 }
 0x265   :  { %v244_v57 = vadd.f32 %v243_v56, %v176_v55  ;;  %v328_v58 = vpop.f32.mrb[1].mxu1 }
 0x267   :  { %248 = vst.msk [vmem:[#allocation6] sm:$0x1] %vm247_vm1, %v244_v57 }
 0x268   :  { %406 = shalt.err (!%p403_p12)
}
 0x269   :  { %s407_s2 = scalar_lea.hbm %s485_s3, 16 }
 0x26a   :  { %p408_p13 = scmp.ne.s32.totalorder %s485_s3, %s407_s2  ;;  %p411_p0 = scmp.lt.u32.totalorder %s407_s2, %s485_s3 }
 0x26c   :  { %p413_p1 = pnand %p411_p0, %p408_p13 }
 0x26e   :  { %416 = shalt.err (!%p413_p1)
}
 0x26f   :  { %258 = dma.vmem_to_hbm [thread:$0]  %s256_s29, 16, %s485_s3, [#allocation5]  }
 0x270   :  { %419 = dma.done.wait [#allocation5], 16  }
 0x271   :  { %420 = vsyncadd [#allocation5], 4294967280 }
 0x272   :  { %262 = vsyncpa [#allocation4], 1 }
 0x273   :  { %263 = vsyncpa [#allocation5], 1 }

</bundles_post_ra>
